<compile_context>
chip_gen: v6e
topology: v6e:2x2x1
jax: 0.10.0
libtpu: 0.0.40
codegen_flags: <defaults>
</compile_context>

<pallas_src>
import numpy as np
import jax
import jax.numpy as jnp
from jax.experimental import pallas as pl
from jax.experimental.pallas import tpu as pltpu

BN_EPS = 1e-5
_VMEM_LIMIT = 48 * 1024 * 1024  # sized for v7x's 64 MiB physical VMEM


# ----------------------------------------------------------------------------
# Stage kernel: (folded BN) -> ReLU -> depthwise KxK -> 1x1 conv -> partial BN stats
# ----------------------------------------------------------------------------
def _make_stage_kernel(K, H, W, pad, C_out):
    M = H * W
    data_off = pad * W + pad  # where (row 0, col 0) of the image sits in the halo buffer

    def kernel(x_ref, wdw_ref, wpw_ref, scale_ref, shift_ref, mask_ref,
               y_ref, ssum_ref, ssq_ref, buf_ref):
        # x_ref:     (1, C, M)    input channels, flattened spatial
        # wdw_ref:   (K*K, C, 1)  depthwise taps (per-channel scalars)
        # wpw_ref:   (C_out, C)   1x1 conv weights
        # scale_ref: (C, 1)       previous-stage BN folded into a pre-ReLU affine
        # shift_ref: (C, 1)       (identity for stage 1)
        # mask_ref:  (K, 1, M)    column-validity mask per horizontal tap offset
        # y_ref:     (1, C_out, M)   un-normalized conv output (lane-dense)
        # ssum_ref:  (1, C_out, 1)   per-image per-channel sum
        # ssq_ref:   (1, C_out, 1)   per-image per-channel sum of squares
        # buf_ref:   (C, L_buf)      zero-padded halo buffer (VMEM scratch)
        C = x_ref.shape[1]

        # Folded BN of the previous stage, then ReLU (exactly ReLU for stage 1).
        x = jnp.maximum(x_ref[0] * scale_ref[...] + shift_ref[...], 0.0)      # (C, M)

        # Zero-padded halo buffer: `pad` zero rows above/below plus +-pad lane slack so
        # every tap slice below is a plain contiguous, in-bounds lane slice.
        buf_ref[...] = jnp.zeros_like(buf_ref)
        buf_ref[:, data_off:data_off + M] = x

        # Depthwise KxK conv, stride 1, 'same' padding.
        col_masks = [mask_ref[dw] if dw != pad else None for dw in range(K)]  # (1, M)
        acc = jnp.zeros((C, M), jnp.float32)
        for dh in range(K):
            for dw in range(K):
                tap = wdw_ref[dh * K + dw]                                    # (C, 1)
                start = dh * W + dw
                contrib = buf_ref[:, start:start + M] * tap                   # (C, M)
                if col_masks[dw] is not None:
                    contrib = contrib * col_masks[dw]
                acc = acc + contrib

        # Pointwise (1x1) conv -> (C_out, M), lane-dense.
        if C <= 8:
            # Tiny contraction: exact-f32 VPU outer-product accumulation.
            y = jnp.zeros((C_out, M), jnp.float32)
            for c in range(C):
                y = y + wpw_ref[:, c:c + 1] * acc[c:c + 1, :]
        else:
            y = jnp.dot(wpw_ref[...], acc, preferred_element_type=jnp.float32)

        y_ref[0] = y
        # Per-image partial BN statistics (summed across the batch in the wrapper).
        ssum_ref[0] = jnp.sum(y, axis=1, keepdims=True)
        ssq_ref[0] = jnp.sum(y * y, axis=1, keepdims=True)

    return kernel


def _run_stage(x_flat, wdw, wpw, scale, shift, masks, *, K, H, W, pad, C_out):
    N, C, M = x_flat.shape
    L_buf = (H + 2 * pad) * W + 2 * pad
    kernel = _make_stage_kernel(K, H, W, pad, C_out)

    flops = int(N * M * (2 * K * K * C + 2 * C * C_out + 4 * C_out + 3 * C))
    bytes_accessed = int(4 * (x_flat.size + wdw.size + wpw.size + masks.size
                              + scale.size + shift.size + N * C_out * (M + 2)))

    return pl.pallas_call(
        kernel,
        out_shape=(
            jax.ShapeDtypeStruct((N, C_out, M), jnp.float32),
            jax.ShapeDtypeStruct((N, C_out, 1), jnp.float32),
            jax.ShapeDtypeStruct((N, C_out, 1), jnp.float32),
        ),
        grid_spec=pltpu.PrefetchScalarGridSpec(
            num_scalar_prefetch=0,
            grid=(N,),
            in_specs=[
                pl.BlockSpec((1, C, M), lambda n: (n, 0, 0)),
                pl.BlockSpec((K * K, C, 1), lambda n: (0, 0, 0)),
                pl.BlockSpec((C_out, C), lambda n: (0, 0)),
                pl.BlockSpec((C, 1), lambda n: (0, 0)),
                pl.BlockSpec((C, 1), lambda n: (0, 0)),
                pl.BlockSpec((K, 1, M), lambda n: (0, 0, 0)),
            ],
            out_specs=(
                pl.BlockSpec((1, C_out, M), lambda n: (n, 0, 0)),
                pl.BlockSpec((1, C_out, 1), lambda n: (n, 0, 0)),
                pl.BlockSpec((1, C_out, 1), lambda n: (n, 0, 0)),
            ),
            scratch_shapes=[pltpu.VMEM((C, L_buf), jnp.float32)],
        ),
        compiler_params=pltpu.CompilerParams(
            dimension_semantics=("parallel",),
            vmem_limit_bytes=_VMEM_LIMIT,
        ),
        cost_estimate=pl.CostEstimate(
            flops=flops, transcendentals=0, bytes_accessed=bytes_accessed),
    )(x_flat, wdw, wpw, scale, shift, masks)


# ----------------------------------------------------------------------------
# Final BN apply kernel (lane-dense elementwise)
# ----------------------------------------------------------------------------
def _bn_apply_kernel(y_ref, scale_ref, shift_ref, o_ref):
    o_ref[0] = y_ref[0] * scale_ref[...] + shift_ref[...]


def _run_bn_apply(y_flat, scale, shift):
    N, C, M = y_flat.shape
    return pl.pallas_call(
        _bn_apply_kernel,
        out_shape=jax.ShapeDtypeStruct((N, C, M), jnp.float32),
        grid_spec=pltpu.PrefetchScalarGridSpec(
            num_scalar_prefetch=0,
            grid=(N,),
            in_specs=[
                pl.BlockSpec((1, C, M), lambda n: (n, 0, 0)),
                pl.BlockSpec((C, 1), lambda n: (0, 0)),
                pl.BlockSpec((C, 1), lambda n: (0, 0)),
            ],
            out_specs=pl.BlockSpec((1, C, M), lambda n: (n, 0, 0)),
        ),
        compiler_params=pltpu.CompilerParams(
            dimension_semantics=("parallel",),
            vmem_limit_bytes=_VMEM_LIMIT,
        ),
        cost_estimate=pl.CostEstimate(
            flops=int(2 * y_flat.size), transcendentals=0,
            bytes_accessed=int(4 * (2 * y_flat.size + 2 * C))),
    )(y_flat, scale, shift)


# ----------------------------------------------------------------------------
# Wrapper glue (all trace-time / (C,)-sized work, no big HBM round trips)
# ----------------------------------------------------------------------------
def _bn_fold(ssum, ssq, count, gamma, beta):
    s1 = jnp.sum(ssum[:, :, 0], axis=0)                    # (C,)
    s2 = jnp.sum(ssq[:, :, 0], axis=0)                     # (C,)
    mean = s1 / count
    var = s2 / count - mean * mean                         # biased (BN training mode)
    inv = jax.lax.rsqrt(var + BN_EPS)
    scale = gamma.astype(jnp.float32) * inv
    shift = beta.astype(jnp.float32) - mean * scale
    return scale.reshape(-1, 1), shift.reshape(-1, 1)


def _prep_depthwise(w, K):
    # torch layout (C, 1, K, K) -> (K*K, C, 1) so wdw_ref[dh*K + dw] is the (C, 1) tap.
    C = w.shape[0]
    return jnp.transpose(w.reshape(C, K, K), (1, 2, 0)).reshape(K * K, C, 1).astype(jnp.float32)


def _col_masks(K, pad, H, W):
    cols = np.arange(W)
    rows = []
    for dw in range(K):
        valid = ((cols + dw - pad >= 0) & (cols + dw - pad < W)).astype(np.float32)
        rows.append(np.tile(valid, H))
    return jnp.asarray(np.stack(rows).reshape(K, 1, H * W))


def sepconv_forward(x_nchw, dw1, pw1, gamma1, beta1, dw2, pw2, gamma2, beta2,
                    kernel_size, stride, padding):
    N, C_in, H, W = x_nchw.shape
    K = kernel_size
    assert stride == 1 and 2 * padding == K - 1, (
        "only the standard stride=1, 'same'-padding SepConv config is implemented")

    C_mid = pw1.shape[0]
    C_out = pw2.shape[0]
    M = H * W

    masks = _col_masks(K, padding, H, W)
    wdw1 = _prep_depthwise(dw1, K)
    wdw2 = _prep_depthwise(dw2, K)
    wpw1 = pw1.reshape(C_mid, C_in).astype(jnp.float32)
    wpw2 = pw2.reshape(C_out, C_mid).astype(jnp.float32)

    # NCHW -> (N, C, H*W) is a free minor-dim-merging bitcast; (H, W) travel statically.
    x_flat = x_nchw.reshape(N, C_in, M).astype(jnp.float32)

    one = jnp.ones((C_in, 1), jnp.float32)
    zero = jnp.zeros((C_in, 1), jnp.float32)

    # Stage 1: ReLU -> depthwise -> 1x1, plus partial BN1 stats.
    y1, s1, q1 = _run_stage(x_flat, wdw1, wpw1, one, zero, masks,
                            K=K, H=H, W=W, pad=padding, C_out=C_mid)
    scale1, shift1 = _bn_fold(s1, q1, N * M, gamma1, beta1)

    # Stage 2: BN1 (folded into the pre-ReLU affine) -> ReLU -> depthwise -> 1x1, BN2 stats.
    y2, s2, q2 = _run_stage(y1, wdw2, wpw2, scale1, shift1, masks,
                            K=K, H=H, W=W, pad=padding, C_out=C_out)
    scale2, shift2 = _bn_fold(s2, q2, N * M, gamma2, beta2)

    # Stage 3: apply BN2.
    out_flat = _run_bn_apply(y2, scale2, shift2)
    return out_flat.reshape(N, C_out, H, W)


# ----------------------------------------------------------------------------
# Pure-JAX reference (exact-f32 convolutions) for the self-check
# ----------------------------------------------------------------------------
def _reference(x, dw1, pw1, g1, b1, dw2, pw2, g2, b2, stride, padding):
    hp = jax.lax.Precision.HIGHEST

    def dwconv(z, w, s):
        return jax.lax.conv_general_dilated(
            z, w, window_strides=(s, s), padding=[(padding, padding)] * 2,
            dimension_numbers=("NCHW", "OIHW", "NCHW"),
            feature_group_count=z.shape[1], precision=hp)

    def pwconv(z, w):
        return jax.lax.conv_general_dilated(
            z, w, window_strides=(1, 1), padding="VALID",
            dimension_numbers=("NCHW", "OIHW", "NCHW"), precision=hp)

    def bn(z, g, b):
        mean = jnp.mean(z, axis=(0, 2, 3), keepdims=True)
        var = jnp.mean((z - mean) ** 2, axis=(0, 2, 3), keepdims=True)
        return ((z - mean) * jax.lax.rsqrt(var + BN_EPS) * g.reshape(1, -1, 1, 1)
                + b.reshape(1, -1, 1, 1))

    z = jnp.maximum(x, 0.0)
    z = bn(pwconv(dwconv(z, dw1, stride), pw1), g1, b1)
    z = jnp.maximum(z, 0.0)
    z = bn(pwconv(dwconv(z, dw2, 1), pw2), g2, b2)
    return z


if __name__ == "__main__":
    # Small shapes consistent with the module: SepConv(C_in=4, C_out=8, k=3, stride=1, pad=1).
    N, C_in, C_out, H, W = 2, 4, 8, 16, 16
    K, stride, padding = 3, 1, 1

    key = jax.random.PRNGKey(0)
    kx, k1, k2, k3, k4 = jax.random.split(key, 5)
    x = jax.random.normal(kx, (N, C_in, H, W), dtype=jnp.float32)
    # PyTorch-layout conv weights.
    dw1 = 0.2 * jax.random.normal(k1, (C_in, 1, K, K), dtype=jnp.float32)
    pw1 = 0.2 * jax.random.normal(k2, (C_in, C_in, 1, 1), dtype=jnp.float32)
    dw2 = 0.2 * jax.random.normal(k3, (C_in, 1, K, K), dtype=jnp.float32)
    pw2 = 0.2 * jax.random.normal(k4, (C_out, C_in, 1, 1), dtype=jnp.float32)
    # BatchNorm affine params at init (weight=1, bias=0), training-mode batch stats.
    gamma1 = jnp.ones((C_in,), jnp.float32)
    beta1 = jnp.zeros((C_in,), jnp.float32)
    gamma2 = jnp.ones((C_out,), jnp.float32)
    beta2 = jnp.zeros((C_out,), jnp.float32)

    out = sepconv_forward(x, dw1, pw1, gamma1, beta1, dw2, pw2, gamma2, beta2,
                          K, stride, padding)
    out = jax.block_until_ready(out)

    ref = _reference(x, dw1, pw1, gamma1, beta1, dw2, pw2, gamma2, beta2, stride, padding)
    assert out.shape == (N, C_out, H, W)
    err = float(jnp.max(jnp.abs(out - ref)))
    assert err < 1e-4, f"max abs err {err}"

    print("KERNEL_OK")
</pallas_src>

<mosaic_0001>
module attributes {stable_mosaic.version = 11 : i64} {
  func.func @kernel(%arg0: i32, %arg1: memref<1x4x256xf32, #tpu.memory_space<vmem>>, %arg2: memref<9x4x1xf32, #tpu.memory_space<vmem>>, %arg3: memref<4x4xf32, #tpu.memory_space<vmem>>, %arg4: memref<4x1xf32, #tpu.memory_space<vmem>>, %arg5: memref<4x1xf32, #tpu.memory_space<vmem>>, %arg6: memref<3x1x256xf32, #tpu.memory_space<vmem>>, %arg7: memref<1x4x256xf32, #tpu.memory_space<vmem>>, %arg8: memref<1x4x1xf32, #tpu.memory_space<vmem>>, %arg9: memref<1x4x1xf32, #tpu.memory_space<vmem>>, %arg10: memref<4x290xf32, #tpu.memory_space<vmem>>) attributes {dimension_semantics = [#tpu.dimension_semantics<parallel>], iteration_bounds = array<i64: 2>, scalar_prefetch = 0 : i64, scratch_operands = 1 : i64, tpu.core_type = #tpu.core_type<tc>, window_params = [{transform_indices = @transform_0, window_bounds = array<i64: 1, 4, 256>}, {pipeline_mode = #tpu.pipeline_mode<synchronous>, transform_indices = @transform_1, window_bounds = array<i64: 9, 4, 1>}, {pipeline_mode = #tpu.pipeline_mode<synchronous>, transform_indices = @transform_2, window_bounds = array<i64: 4, 4>}, {pipeline_mode = #tpu.pipeline_mode<synchronous>, transform_indices = @transform_3, window_bounds = array<i64: 4, 1>}, {pipeline_mode = #tpu.pipeline_mode<synchronous>, transform_indices = @transform_4, window_bounds = array<i64: 4, 1>}, {pipeline_mode = #tpu.pipeline_mode<synchronous>, transform_indices = @transform_5, window_bounds = array<i64: 3, 1, 256>}, {transform_indices = @transform_6, window_bounds = array<i64: 1, 4, 256>}, {transform_indices = @transform_7, window_bounds = array<i64: 1, 4, 1>}, {transform_indices = @transform_8, window_bounds = array<i64: 1, 4, 1>}]} {
    %c0 = arith.constant 0 : index
    %c0_0 = arith.constant 0 : index
    %c0_1 = arith.constant 0 : index
    %0 = vector.load %arg1[%c0, %c0_0, %c0_1] : memref<1x4x256xf32, #tpu.memory_space<vmem>>, vector<1x4x256xf32>
    %1 = vector.shape_cast %0 : vector<1x4x256xf32> to vector<4x256xf32>
    %c0_2 = arith.constant 0 : index
    %c0_3 = arith.constant 0 : index
    %2 = vector.load %arg4[%c0_2, %c0_3] : memref<4x1xf32, #tpu.memory_space<vmem>>, vector<4x1xf32>
    %3 = vector.broadcast %2 : vector<4x1xf32> to vector<4x256xf32>
    %4 = arith.mulf %1, %3 : vector<4x256xf32>
    %c0_4 = arith.constant 0 : index
    %c0_5 = arith.constant 0 : index
    %5 = vector.load %arg5[%c0_4, %c0_5] : memref<4x1xf32, #tpu.memory_space<vmem>>, vector<4x1xf32>
    %6 = vector.broadcast %5 : vector<4x1xf32> to vector<4x256xf32>
    %7 = arith.addf %4, %6 : vector<4x256xf32>
    %cst = arith.constant 0.000000e+00 : f32
    %8 = vector.broadcast %cst : f32 to vector<4x256xf32>
    %9 = arith.maximumf %7, %8 : vector<4x256xf32>
    %cst_6 = arith.constant 0.000000e+00 : f32
    %10 = vector.broadcast %cst_6 : f32 to vector<4x290xf32>
    %c0_7 = arith.constant 0 : index
    %c0_8 = arith.constant 0 : index
    %11 = vector.load %arg10[%c0_7, %c0_8] : memref<4x290xf32, #tpu.memory_space<vmem>>, vector<4x290xf32>
    tpu.vector_store %arg10[%c0_7, %c0_8], %10 {strides = array<i32>} : memref<4x290xf32, #tpu.memory_space<vmem>>, vector<4x290xf32>,
    %c0_9 = arith.constant 0 : index
    %c17 = arith.constant 17 : index
    %12 = vector.load %arg10[%c0_9, %c17] : memref<4x290xf32, #tpu.memory_space<vmem>>, vector<4x256xf32>
    tpu.vector_store %arg10[%c0_9, %c17], %9 {strides = array<i32>} : memref<4x290xf32, #tpu.memory_space<vmem>>, vector<4x256xf32>,
    %c0_10 = arith.constant 0 : index
    %c0_11 = arith.constant 0 : index
    %c0_12 = arith.constant 0 : index
    %13 = vector.load %arg6[%c0_10, %c0_11, %c0_12] : memref<3x1x256xf32, #tpu.memory_space<vmem>>, vector<1x1x256xf32>
    %14 = vector.shape_cast %13 : vector<1x1x256xf32> to vector<1x256xf32>
    %c2 = arith.constant 2 : index
    %c0_13 = arith.constant 0 : index
    %c0_14 = arith.constant 0 : index
    %15 = vector.load %arg6[%c2, %c0_13, %c0_14] : memref<3x1x256xf32, #tpu.memory_space<vmem>>, vector<1x1x256xf32>
    %16 = vector.shape_cast %15 : vector<1x1x256xf32> to vector<1x256xf32>
    %cst_15 = arith.constant 0.000000e+00 : f32
    %17 = vector.broadcast %cst_15 : f32 to vector<4x256xf32>
    %c0_16 = arith.constant 0 : index
    %c0_17 = arith.constant 0 : index
    %c0_18 = arith.constant 0 : index
    %18 = vector.load %arg2[%c0_16, %c0_17, %c0_18] : memref<9x4x1xf32, #tpu.memory_space<vmem>>, vector<1x4x1xf32>
    %19 = vector.shape_cast %18 : vector<1x4x1xf32> to vector<4x1xf32>
    %c0_19 = arith.constant 0 : index
    %c0_20 = arith.constant 0 : index
    %20 = vector.load %arg10[%c0_19, %c0_20] : memref<4x290xf32, #tpu.memory_space<vmem>>, vector<4x256xf32>
    %21 = vector.broadcast %19 : vector<4x1xf32> to vector<4x256xf32>
    %22 = arith.mulf %20, %21 : vector<4x256xf32>
    %23 = vector.broadcast %14 : vector<1x256xf32> to vector<4x256xf32>
    %24 = arith.mulf %22, %23 : vector<4x256xf32>
    %25 = arith.addf %17, %24 : vector<4x256xf32>
    %c1 = arith.constant 1 : index
    %c0_21 = arith.constant 0 : index
    %c0_22 = arith.constant 0 : index
    %26 = vector.load %arg2[%c1, %c0_21, %c0_22] : memref<9x4x1xf32, #tpu.memory_space<vmem>>, vector<1x4x1xf32>
    %27 = vector.shape_cast %26 : vector<1x4x1xf32> to vector<4x1xf32>
    %c0_23 = arith.constant 0 : index
    %c1_24 = arith.constant 1 : index
    %28 = vector.load %arg10[%c0_23, %c1_24] : memref<4x290xf32, #tpu.memory_space<vmem>>, vector<4x256xf32>
    %29 = vector.broadcast %27 : vector<4x1xf32> to vector<4x256xf32>
    %30 = arith.mulf %28, %29 : vector<4x256xf32>
    %31 = arith.addf %25, %30 : vector<4x256xf32>
    %c2_25 = arith.constant 2 : index
    %c0_26 = arith.constant 0 : index
    %c0_27 = arith.constant 0 : index
    %32 = vector.load %arg2[%c2_25, %c0_26, %c0_27] : memref<9x4x1xf32, #tpu.memory_space<vmem>>, vector<1x4x1xf32>
    %33 = vector.shape_cast %32 : vector<1x4x1xf32> to vector<4x1xf32>
    %c0_28 = arith.constant 0 : index
    %c2_29 = arith.constant 2 : index
    %34 = vector.load %arg10[%c0_28, %c2_29] : memref<4x290xf32, #tpu.memory_space<vmem>>, vector<4x256xf32>
    %35 = vector.broadcast %33 : vector<4x1xf32> to vector<4x256xf32>
    %36 = arith.mulf %34, %35 : vector<4x256xf32>
    %37 = vector.broadcast %16 : vector<1x256xf32> to vector<4x256xf32>
    %38 = arith.mulf %36, %37 : vector<4x256xf32>
    %39 = arith.addf %31, %38 : vector<4x256xf32>
    %c3 = arith.constant 3 : index
    %c0_30 = arith.constant 0 : index
    %c0_31 = arith.constant 0 : index
    %40 = vector.load %arg2[%c3, %c0_30, %c0_31] : memref<9x4x1xf32, #tpu.memory_space<vmem>>, vector<1x4x1xf32>
    %41 = vector.shape_cast %40 : vector<1x4x1xf32> to vector<4x1xf32>
    %c0_32 = arith.constant 0 : index
    %c16 = arith.constant 16 : index
    %42 = vector.load %arg10[%c0_32, %c16] : memref<4x290xf32, #tpu.memory_space<vmem>>, vector<4x256xf32>
    %43 = vector.broadcast %41 : vector<4x1xf32> to vector<4x256xf32>
    %44 = arith.mulf %42, %43 : vector<4x256xf32>
    %45 = vector.broadcast %14 : vector<1x256xf32> to vector<4x256xf32>
    %46 = arith.mulf %44, %45 : vector<4x256xf32>
    %47 = arith.addf %39, %46 : vector<4x256xf32>
    %c4 = arith.constant 4 : index
    %c0_33 = arith.constant 0 : index
    %c0_34 = arith.constant 0 : index
    %48 = vector.load %arg2[%c4, %c0_33, %c0_34] : memref<9x4x1xf32, #tpu.memory_space<vmem>>, vector<1x4x1xf32>
    %49 = vector.shape_cast %48 : vector<1x4x1xf32> to vector<4x1xf32>
    %c0_35 = arith.constant 0 : index
    %c17_36 = arith.constant 17 : index
    %50 = vector.load %arg10[%c0_35, %c17_36] : memref<4x290xf32, #tpu.memory_space<vmem>>, vector<4x256xf32>
    %51 = vector.broadcast %49 : vector<4x1xf32> to vector<4x256xf32>
    %52 = arith.mulf %50, %51 : vector<4x256xf32>
    %53 = arith.addf %47, %52 : vector<4x256xf32>
    %c5 = arith.constant 5 : index
    %c0_37 = arith.constant 0 : index
    %c0_38 = arith.constant 0 : index
    %54 = vector.load %arg2[%c5, %c0_37, %c0_38] : memref<9x4x1xf32, #tpu.memory_space<vmem>>, vector<1x4x1xf32>
    %55 = vector.shape_cast %54 : vector<1x4x1xf32> to vector<4x1xf32>
    %c0_39 = arith.constant 0 : index
    %c18 = arith.constant 18 : index
    %56 = vector.load %arg10[%c0_39, %c18] : memref<4x290xf32, #tpu.memory_space<vmem>>, vector<4x256xf32>
    %57 = vector.broadcast %55 : vector<4x1xf32> to vector<4x256xf32>
    %58 = arith.mulf %56, %57 : vector<4x256xf32>
    %59 = vector.broadcast %16 : vector<1x256xf32> to vector<4x256xf32>
    %60 = arith.mulf %58, %59 : vector<4x256xf32>
    %61 = arith.addf %53, %60 : vector<4x256xf32>
    %c6 = arith.constant 6 : index
    %c0_40 = arith.constant 0 : index
    %c0_41 = arith.constant 0 : index
    %62 = vector.load %arg2[%c6, %c0_40, %c0_41] : memref<9x4x1xf32, #tpu.memory_space<vmem>>, vector<1x4x1xf32>
    %63 = vector.shape_cast %62 : vector<1x4x1xf32> to vector<4x1xf32>
    %c0_42 = arith.constant 0 : index
    %c32 = arith.constant 32 : index
    %64 = vector.load %arg10[%c0_42, %c32] : memref<4x290xf32, #tpu.memory_space<vmem>>, vector<4x256xf32>
    %65 = vector.broadcast %63 : vector<4x1xf32> to vector<4x256xf32>
    %66 = arith.mulf %64, %65 : vector<4x256xf32>
    %67 = vector.broadcast %14 : vector<1x256xf32> to vector<4x256xf32>
    %68 = arith.mulf %66, %67 : vector<4x256xf32>
    %69 = arith.addf %61, %68 : vector<4x256xf32>
    %c7 = arith.constant 7 : index
    %c0_43 = arith.constant 0 : index
    %c0_44 = arith.constant 0 : index
    %70 = vector.load %arg2[%c7, %c0_43, %c0_44] : memref<9x4x1xf32, #tpu.memory_space<vmem>>, vector<1x4x1xf32>
    %71 = vector.shape_cast %70 : vector<1x4x1xf32> to vector<4x1xf32>
    %c0_45 = arith.constant 0 : index
    %c33 = arith.constant 33 : index
    %72 = vector.load %arg10[%c0_45, %c33] : memref<4x290xf32, #tpu.memory_space<vmem>>, vector<4x256xf32>
    %73 = vector.broadcast %71 : vector<4x1xf32> to vector<4x256xf32>
    %74 = arith.mulf %72, %73 : vector<4x256xf32>
    %75 = arith.addf %69, %74 : vector<4x256xf32>
    %c8 = arith.constant 8 : index
    %c0_46 = arith.constant 0 : index
    %c0_47 = arith.constant 0 : index
    %76 = vector.load %arg2[%c8, %c0_46, %c0_47] : memref<9x4x1xf32, #tpu.memory_space<vmem>>, vector<1x4x1xf32>
    %77 = vector.shape_cast %76 : vector<1x4x1xf32> to vector<4x1xf32>
    %c0_48 = arith.constant 0 : index
    %c34 = arith.constant 34 : index
    %78 = vector.load %arg10[%c0_48, %c34] : memref<4x290xf32, #tpu.memory_space<vmem>>, vector<4x256xf32>
    %79 = vector.broadcast %77 : vector<4x1xf32> to vector<4x256xf32>
    %80 = arith.mulf %78, %79 : vector<4x256xf32>
    %81 = vector.broadcast %16 : vector<1x256xf32> to vector<4x256xf32>
    %82 = arith.mulf %80, %81 : vector<4x256xf32>
    %83 = arith.addf %75, %82 : vector<4x256xf32>
    %cst_49 = arith.constant 0.000000e+00 : f32
    %84 = vector.broadcast %cst_49 : f32 to vector<4x256xf32>
    %c0_50 = arith.constant 0 : index
    %c0_51 = arith.constant 0 : index
    %85 = vector.load %arg3[%c0_50, %c0_51] : memref<4x4xf32, #tpu.memory_space<vmem>>, vector<4x1xf32>
    %86 = vector.extract_strided_slice %83 {offsets = [0, 0], sizes = [1, 256], strides = [1, 1]} : vector<4x256xf32> to vector<1x256xf32>
    %87 = vector.broadcast %85 : vector<4x1xf32> to vector<4x256xf32>
    %88 = vector.broadcast %86 : vector<1x256xf32> to vector<4x256xf32>
    %89 = arith.mulf %87, %88 : vector<4x256xf32>
    %90 = arith.addf %84, %89 : vector<4x256xf32>
    %c0_52 = arith.constant 0 : index
    %c1_53 = arith.constant 1 : index
    %91 = vector.load %arg3[%c0_52, %c1_53] : memref<4x4xf32, #tpu.memory_space<vmem>>, vector<4x1xf32>
    %92 = vector.extract_strided_slice %83 {offsets = [1, 0], sizes = [1, 256], strides = [1, 1]} : vector<4x256xf32> to vector<1x256xf32>
    %93 = vector.broadcast %91 : vector<4x1xf32> to vector<4x256xf32>
    %94 = vector.broadcast %92 : vector<1x256xf32> to vector<4x256xf32>
    %95 = arith.mulf %93, %94 : vector<4x256xf32>
    %96 = arith.addf %90, %95 : vector<4x256xf32>
    %c0_54 = arith.constant 0 : index
    %c2_55 = arith.constant 2 : index
    %97 = vector.load %arg3[%c0_54, %c2_55] : memref<4x4xf32, #tpu.memory_space<vmem>>, vector<4x1xf32>
    %98 = vector.extract_strided_slice %83 {offsets = [2, 0], sizes = [1, 256], strides = [1, 1]} : vector<4x256xf32> to vector<1x256xf32>
    %99 = vector.broadcast %97 : vector<4x1xf32> to vector<4x256xf32>
    %100 = vector.broadcast %98 : vector<1x256xf32> to vector<4x256xf32>
    %101 = arith.mulf %99, %100 : vector<4x256xf32>
    %102 = arith.addf %96, %101 : vector<4x256xf32>
    %c0_56 = arith.constant 0 : index
    %c3_57 = arith.constant 3 : index
    %103 = vector.load %arg3[%c0_56, %c3_57] : memref<4x4xf32, #tpu.memory_space<vmem>>, vector<4x1xf32>
    %104 = vector.extract_strided_slice %83 {offsets = [3, 0], sizes = [1, 256], strides = [1, 1]} : vector<4x256xf32> to vector<1x256xf32>
    %105 = vector.broadcast %103 : vector<4x1xf32> to vector<4x256xf32>
    %106 = vector.broadcast %104 : vector<1x256xf32> to vector<4x256xf32>
    %107 = arith.mulf %105, %106 : vector<4x256xf32>
    %108 = arith.addf %102, %107 : vector<4x256xf32>
    %c0_58 = arith.constant 0 : index
    %c0_59 = arith.constant 0 : index
    %c0_60 = arith.constant 0 : index
    %109 = vector.load %arg7[%c0_58, %c0_59, %c0_60] : memref<1x4x256xf32, #tpu.memory_space<vmem>>, vector<1x4x256xf32>
    %110 = vector.shape_cast %109 : vector<1x4x256xf32> to vector<4x256xf32>
    %111 = vector.shape_cast %108 : vector<4x256xf32> to vector<1x4x256xf32>
    tpu.vector_store %arg7[%c0_58, %c0_59, %c0_60], %111 {strides = array<i32>} : memref<1x4x256xf32, #tpu.memory_space<vmem>>, vector<1x4x256xf32>,
    %cst_61 = arith.constant dense<0.000000e+00> : vector<4xf32>
    %112 = vector.multi_reduction <add>, %108, %cst_61 [1] : vector<4x256xf32> to vector<4xf32>
    %113 = vector.shape_cast %112 : vector<4xf32> to vector<4x1xf32>
    %c0_62 = arith.constant 0 : index
    %c0_63 = arith.constant 0 : index
    %c0_64 = arith.constant 0 : index
    %114 = vector.load %arg8[%c0_62, %c0_63, %c0_64] : memref<1x4x1xf32, #tpu.memory_space<vmem>>, vector<1x4x1xf32>
    %115 = vector.shape_cast %114 : vector<1x4x1xf32> to vector<4x1xf32>
    %116 = vector.shape_cast %113 : vector<4x1xf32> to vector<1x4x1xf32>
    tpu.vector_store %arg8[%c0_62, %c0_63, %c0_64], %116 {strides = array<i32>} : memref<1x4x1xf32, #tpu.memory_space<vmem>>, vector<1x4x1xf32>,
    %117 = arith.mulf %108, %108 : vector<4x256xf32>
    %cst_65 = arith.constant dense<0.000000e+00> : vector<4xf32>
    %118 = vector.multi_reduction <add>, %117, %cst_65 [1] : vector<4x256xf32> to vector<4xf32>
    %119 = vector.shape_cast %118 : vector<4xf32> to vector<4x1xf32>
    %c0_66 = arith.constant 0 : index
    %c0_67 = arith.constant 0 : index
    %c0_68 = arith.constant 0 : index
    %120 = vector.load %arg9[%c0_66, %c0_67, %c0_68] : memref<1x4x1xf32, #tpu.memory_space<vmem>>, vector<1x4x1xf32>
    %121 = vector.shape_cast %120 : vector<1x4x1xf32> to vector<4x1xf32>
    %122 = vector.shape_cast %119 : vector<4x1xf32> to vector<1x4x1xf32>
    tpu.vector_store %arg9[%c0_66, %c0_67, %c0_68], %122 {strides = array<i32>} : memref<1x4x1xf32, #tpu.memory_space<vmem>>, vector<1x4x1xf32>,
    return
  }
  func.func @transform_0(%arg0: i32) -> (i32, i32, i32) {
    %c0_i32 = arith.constant 0 : i32
    %c0_i32_0 = arith.constant 0 : i32
    %c0_i32_1 = arith.constant 0 : i32
    return %arg0, %c0_i32, %c0_i32_0 : i32, i32, i32
  }
  func.func @transform_1(%arg0: i32) -> (i32, i32, i32) {
    %c0_i32 = arith.constant 0 : i32
    %c0_i32_0 = arith.constant 0 : i32
    %c0_i32_1 = arith.constant 0 : i32
    %c0_i32_2 = arith.constant 0 : i32
    return %c0_i32, %c0_i32_0, %c0_i32_1 : i32, i32, i32
  }
  func.func @transform_2(%arg0: i32) -> (i32, i32) {
    %c0_i32 = arith.constant 0 : i32
    %c0_i32_0 = arith.constant 0 : i32
    %c0_i32_1 = arith.constant 0 : i32
    return %c0_i32, %c0_i32_0 : i32, i32
  }
  func.func @transform_3(%arg0: i32) -> (i32, i32) {
    %c0_i32 = arith.constant 0 : i32
    %c0_i32_0 = arith.constant 0 : i32
    %c0_i32_1 = arith.constant 0 : i32
    return %c0_i32, %c0_i32_0 : i32, i32
  }
  func.func @transform_4(%arg0: i32) -> (i32, i32) {
    %c0_i32 = arith.constant 0 : i32
    %c0_i32_0 = arith.constant 0 : i32
    %c0_i32_1 = arith.constant 0 : i32
    return %c0_i32, %c0_i32_0 : i32, i32
  }
  func.func @transform_5(%arg0: i32) -> (i32, i32, i32) {
    %c0_i32 = arith.constant 0 : i32
    %c0_i32_0 = arith.constant 0 : i32
    %c0_i32_1 = arith.constant 0 : i32
    %c0_i32_2 = arith.constant 0 : i32
    return %c0_i32, %c0_i32_0, %c0_i32_1 : i32, i32, i32
  }
  func.func @transform_6(%arg0: i32) -> (i32, i32, i32) {
    %c0_i32 = arith.constant 0 : i32
    %c0_i32_0 = arith.constant 0 : i32
    %c0_i32_1 = arith.constant 0 : i32
    return %arg0, %c0_i32, %c0_i32_0 : i32, i32, i32
  }
  func.func @transform_7(%arg0: i32) -> (i32, i32, i32) {
    %c0_i32 = arith.constant 0 : i32
    %c0_i32_0 = arith.constant 0 : i32
    %c0_i32_1 = arith.constant 0 : i32
    return %arg0, %c0_i32, %c0_i32_0 : i32, i32, i32
  }
  func.func @transform_8(%arg0: i32) -> (i32, i32, i32) {
    %c0_i32 = arith.constant 0 : i32
    %c0_i32_0 = arith.constant 0 : i32
    %c0_i32_1 = arith.constant 0 : i32
    return %arg0, %c0_i32, %c0_i32_0 : i32, i32, i32
  }
}

</mosaic_0001>

<bundles_post_ra>
// kernel: tpu_custom_call.1
= control target key start
LH: loop header
LB: loop body
LE: loop exit
PB: predicated region body
PF: predicated region fallthrough
CT: control target
= control target key end

     0   :  { %s1387_s0 = inlined_call_operand.vmem [shape: f32[2,4,256], index: 0, kind: input, shape index: {}]   ;;  %s1388_s1 = inlined_call_operand.vmem [shape: f32[9,4,1], index: 1, kind: input, shape index: {}]   ;;  %s1389_s2 = inlined_call_operand.vmem [shape: f32[4,4], index: 2, kind: input, shape index: {}]   ;;  %s1390_s3 = inlined_call_operand.vmem [shape: f32[4,1], index: 3, kind: input, shape index: {}]   ;;  %s1391_s4 = inlined_call_operand.vmem [shape: f32[4,1], index: 4, kind: input, shape index: {}]   ;;  %s1392_s5 = inlined_call_operand.vmem [shape: f32[3,1,256], index: 5, kind: input, shape index: {}]   ;;  %s1393_s6 = inlined_call_operand.hbm [shape: f32[2,4,256], index: 6, kind: output, shape index: {0}]   ;;  %s1394_s7 = inlined_call_operand.vmem [shape: f32[2,4,1], index: 7, kind: output, shape index: {1}]   ;;  %s1395_s8 = inlined_call_operand.vmem [shape: f32[2,4,1], index: 8, kind: output, shape index: {2}]  }
   0x1   :  { %1396 = sst [smem:[#allocation6_spill]] %s1387_s0 }
   0x2   :  { %14 = vsyncpa [#allocation4], 0 }
   0x3   :  { %16 = vsyncpa [#allocation4 + $0x1], 0  ;;  %s1182_s27 = smov 0   ;;  %s1184_s28 = smov 0  }
   0x4   :  { %s1186_s29 = smov 0   ;;  %s1188_s30 = smov 0  }
   0x5 LB: > { %s1203_s9 = sadd.s32 4294967295, %s1114_s30   ;;  %s964_s10 = sadd.s32 4294967294, %s1114_s30   ;;  %s1114_s30 = sphi %s1188_s30, %s1403_s30   ;;  %s1110_s29 = sphi %s1186_s29, %s1402_s29   ;;  %s1106_s28 = sphi %s1184_s28, %s1401_s28   ;;  %s1102_s27 = sphi %s1182_s27, %s1400_s27  }
   0x6   : > { %s1207_s11 = sadd.s32 1, %s1114_s30   ;;  %s160_s12 = sadd.s32 1, %s1110_s29 }
   0x7   : > { %s157_s13 = ssub.s32 %s1114_s30, %s1207_s11  ;;  %p170_p0 = scmp.ne.s32.totalorder %s1110_s29, %s1106_s28 }
   0x8   : > { %p158_p1 = scmp.eq.s32.totalorder %s157_s13, 0  ;;  %p171_p2 = scmp.eq.s32.totalorder %s1203_s9, 1 }
   0x9   : > { %p176_p3 = scmp.ne.s32.totalorder %s1106_s28, %s1102_s27  ;;  %p177_p4 = scmp.eq.s32.totalorder %s964_s10, 1 }
   0xa   : > { %s1218_s14 = scalar_select %p158_p1, %s1110_s29, %s160_s12  }
   0xb   : > { %p1220_p5 = por %p171_p2, %p170_p0  ;;  %p1224_p6 = por %p177_p4, %p176_p3 }
   0xc   : > { %p967_p7 = scmp.ge.s32.totalorder %s1114_s30, 1  ;;  %p270_p8 = scmp.lt.s32.totalorder %s1114_s30, 3 }
   0xe   : > { %p271_p9 = pnand %p967_p7, %p270_p8 }
   0xf   : > { %s1117_s13 = smov (!%p271_p9), 2   ;;  %s1118_s25 = smov (!%p271_p9), 32  }
  0x10   : > { %274 = sbr.rel (%p271_p9) target bundleno = 599 (0x257), region = 44  ;;  %p312_p10 = scmp.lt.s32.totalorder (!%p271_p9), %s1203_s9, 1 }
  0x11   : > { %s1399_s0 = sld [smem:[#allocation6_spill]] (!%p271_p9)  ;;  %s1121_s20 = smov (!%p271_p9), 17  }
  0x12   : > { %s1122_s23 = smov (!%p271_p9), 16   ;;  %s1123_s24 = smov (!%p271_p9), 18  }
  0x13   : > { %s1124_s10 = smov (!%p271_p9), 34   ;;  %s1127_s17 = smov (!%p271_p9), 111  }
  0x14   : > { %s1128_s18 = smov (!%p271_p9), 95   ;;  %s1131_s21 = smov (!%p271_p9), 110  }
  0x15   : > { %v326_v0 = vld [vmem:[%s1390_s3] sm:$0xf]  ;;  %v334_v1 = vlaneseq  ;;  %v1116_v2 = vmov 0   ;;  %v973_v5 = vld [vmem:[%s1392_s5 + $0x4] sm:$0x3]  ;;  %vm356_vm0 = vcmask 273408  }
  0x16   : > { %1048 = vset.pattern.permute.xlu0 %v1116_v2  ;;  %1049 = vset.pattern.permute.xlu1 %v1116_v2  ;;  %v340_v4 = vld [vmem:[%s1391_s4] sm:$0xf]  ;;  %v974_v6 = vld [vmem:[%s1388_s1 + $0x4] sm:$0xf]  ;;  %v976_v9 = vld [vmem:[%s1388_s1 + $0xc] sm:$0xf] }
  0x17   : > { %329 = vperm.xlu0 %1048, %v326_v0   ;;  %v1233_v3 = vshrl.u32 %v334_v1, 7  ;;  %409 = vperm.xlu1 %1049, %v974_v6   ;;  %v975_v12 = vld [vmem:[%s1388_s1 + $0x8] sm:$0xf]  ;;  %v978_v14 = vld [vmem:[%s1388_s1 + $0x14] sm:$0xf]  ;;  %v1119_v22 = vmov 0.0  }
  0x18   : > { %v979_v15 = vld [vmem:[%s1388_s1 + $0x18] sm:$0xf]  ;;  %v372_v16 = vld [vmem:[%s1392_s5] sm:$0x3]  ;;  %v980_v19 = vld [vmem:[%s1388_s1 + $0x1c] sm:$0xf] }
  0x19   : > { %v1245_v7 = vsub.s32 0, %v1233_v3  ;;  %v1248_v8 = vsub.s32 1, %v1233_v3  ;;  %v375_v21 = vld [vmem:[%s1388_s1] sm:$0xf]  ;;  %355 = vst [vmem:[#allocation2] sm:$0xff] %v1119_v22  ;;  %s1280_s12 = scalar_select %p312_p10, %s1203_s9, 1 }
  0x1a   : > { %357 = vst.msk [vmem:[#allocation2 + $0x8] sm:$0xf] %vm356_vm0, %v1119_v22  ;;  %v1120_v23 = vmov 839922192   ;;  %v977_v35 = vld [vmem:[%s1388_s1 + $0x10] sm:$0xf] }
  0x1b   : > { %343 = vperm.xlu0 %1048, %v340_v4   ;;  %v455_v10 = vrot.slane %v973_v5, %v1245_v7  ;;  %v459_v11 = vrot.slane %v973_v5, %v1248_v8  ;;  %489 = vperm.xlu1 %1049, %v976_v9   ;;  %v394_v17 = vrot.slane %v372_v16, %v1245_v7  ;;  %v332_v24 = vunpack.c.l.s4 %v1120_v23  ;;  %v981_v36 = vld [vmem:[%s1388_s1 + $0x20] sm:$0xf]  ;;  %s1132_s22 = smov 96   ;;  %s297_s26 = sand.u32 1, %s1106_s28  }
  0x1c   : > { %v398_v18 = vrot.slane %v372_v16, %v1248_v8  ;;  %v1125_v37 = vmov 1   ;;  %vm366_vm1 = vcmask 1043592   ;;  %vm367_vm2 = vcmask 1047556  }
  0x1d   : > { %v460_v13 = vcombine.low %v455_v10, %v459_v11  ;;  %v333_v25 = vunpack.c.0.s8 %v332_v24  ;;  %vm362_vm3 = vcmask 138240   ;;  %vm370_vm4 = vcmask 134144   ;;  %vm368_vm5 = vmor %vm367_vm2, %vm366_vm1 }
  0x1e   : > { %v1272_v20 = vcombine.low %v394_v17, %v398_v18  ;;  %vm464_vm6 = vcmask 15360   ;;  %vm504_vm7 = vcmask 130048   ;;  %vm573_vm8 = vcmask 146432  }
  0x1f   : > { %439 = vperm.xlu0 %1048, %v975_v12   ;;  %v1284_v26 = vsub.s32 %v333_v25, %v1233_v3  ;;  %vm613_vm9 = vcmask 261120   ;;  %vm682_vm10 = vcmask 277504   ;;  %vm429_vm11 = vcmask 1043456  }
  0x20   : > { %vm431_vm12 = vcmask 1039360   ;;  %vm479_vm13 = vcmask 1031168   ;;  %vm519_vm14 = vcmask 916480   ;;  %vm550_vm15 = vcmask 908288  }
  0x21   : > { %vm588_vm0 = vcmask 900096   ;;  %vm628_vm1 = vcmask 785408   ;;  %vm659_vm2 = vcmask 777216  }
  0x23   : > { %461 = vrot.lane.b32.xlu0 %v460_v13, %s1117_s13  ;;  %s987_s13 = sshll.u32 %s1280_s12, 3 }
  0x24   : > { %s316_s19 = scalar_lea.vmem %s1399_s0, %s987_s13  ;;  %s1126_s13 = smov 127  }
  0x25   : > { %v325_v29 = vld [vmem:[%s316_s19] sm:$0xff]  ;;  %s1129_s19 = smov 126  }
  0x27   : > { %558 = vperm.xlu0 %1048, %v978_v14  }
  0x2b   : > { %598 = vperm.xlu0 %1048, %v979_v15  }
  0x2f   : > { %638 = vperm.xlu0 %1048, %v980_v19  }
  0x33   : > { %610 = vrot.lane.b32.xlu0 %v1272_v20, %s1118_s25 }
  0x37   : > { %379 = vperm.xlu0 %1048, %v375_v21  }
  0x3b   : > { %1050 = vset.pattern.permute.xlu0 %v1125_v37 }
  0x92   : > { %v330_v27 = vpop.permute.xlu0 %329  ;;  %v410_v38 = vpop.permute.xlu1 %409 }
  0x93   : > { %v337_v28 = vrot.slane %v330_v27, %v1284_v26  ;;  %v417_v47 = vrot.slane %v410_v38, %v1284_v26 }
  0x95   : > { %v339_v31 = vmul.f32 %v337_v28, %v325_v29 }
  0x96   : > { %v344_v30 = vpop.permute.xlu0 %343  ;;  %v490_v40 = vpop.permute.xlu1 %489 }
  0x97   : > { %v351_v32 = vrot.slane %v344_v30, %v1284_v26  ;;  %v497_v10 = vrot.slane %v490_v40, %v1284_v26 }
  0x99   : > { %v353_v33 = vadd.f32 %v351_v32, %v339_v31 }
  0x9a   : > { %v440_v39 = vpop.permute.xlu0 %439 }
  0x9b   : > { %v354_v34 = vmax.f32 %v353_v33, 0.0  ;;  %v447_v60 = vrot.slane %v440_v39, %v1284_v26 }
  0x9d   : > { %359 = vrot.lane.b32.xlu1 %v354_v34, %s1121_s20  ;;  %s1130_s20 = smov 112  }
  0x9e   : > { %v462_v41 = vpop.permute.xlu0 %461 }
  0x9f   : > { %v463_v62 = vrot.slane %v462_v41, 4 }
  0xa1   : > { %529 = vperm.xlu1 %1049, %v977_v35   ;;  %v465_v6 = vsel %vm464_vm6, %v463_v62, %v462_v41 }
  0xa2   : > { %v559_v44 = vpop.permute.xlu0 %558 }
  0xa3   : > { %v566_v18 = vrot.slane %v559_v44, %v1284_v26 }
  0xa5   : > { %501 = vrot.lane.b32.xlu1 %v1272_v20, %s1122_s23  ;;  %s1133_s23 = smov 94  }
  0xa6   : > { %v599_v46 = vpop.permute.xlu0 %598 }
  0xa7   : > { %v606_v27 = vrot.slane %v599_v46, %v1284_v26  ;;  %v1134_v46 = vmov 2  }
  0xa9   : > { %570 = vrot.lane.b32.xlu1 %v460_v13, %s1123_s24  ;;  %s1136_s24 = smov [#allocation3]  }
  0xaa   : > { %v639_v54 = vpop.permute.xlu0 %638  ;;  %s1058_s25 = sshll.u32 %s1136_s24, 4  ;;  %s1059_s25 = int_to_ptr.vmem [resolvable:$false] %s1058_s25 }
  0xab   : > { %v646_v61 = vrot.slane %v639_v54, %v1284_v26  ;;  %s1060_s0 = scalar_lea.vmem %s1059_s25, 256 }
  0xad   : > { %667 = vperm.xlu1 %1049, %v981_v36  }
  0xae   : > { %v611_v19 = vpop.permute.xlu0 %610 }
  0xaf   : > { %v612_v23 = vrot.slane %v611_v19, 4 }
  0xb1   : > { %679 = vrot.lane.b32.xlu1 %v460_v13, %s1124_s10  ;;  %v614_v35 = vsel %vm613_vm9, %v612_v23, %v611_v19  ;;  %s968_s10 = sshll.u32 %s297_s26, 3 }
 0x10f   : > { %v360_v42 = vpop.permute.xlu1 %359 }
 0x110   : > { %v361_v43 = vrot.slane %v360_v42, 4 }
 0x112   : > { %v363_v45 = vsel %vm362_vm3, %v361_v43, %v360_v42  ;;  %371 = vst.msk [vmem:[#allocation2 + $0x8] sm:$0xf] %vm370_vm4, %v361_v43  ;;  %vm697_vm3 = vcmask 769024  }
 0x113   : > { %369 = vst.msk [vmem:[#allocation2] sm:$0xff] %vm368_vm5, %v363_v45  ;;  %v701_v45 = vld [vmem:[%s1389_s2] sm:$0xf] }
 0x119   : > { %v406_v48 = vld [vmem:[#allocation2 + $0x8] sm:$0xf] }
 0x11a   : > { %v420_v49 = vmul.f32 %v417_v47, %v406_v48  ;;  %v1299_v50 = vld [vmem:[#allocation2] sm:$0xff]  ;;  %v526_v55 = vld [vmem:[#allocation2 + $0x8] sm:$0xf]  ;;  %v450_v1 = vmul.f32 %v447_v60, %v406_v48  ;;  %v380_v48 = vpop.permute.xlu0 %379 }
 0x11b   : > { %v419_v51 = vmul.f32 %v1299_v50, %v417_v47  ;;  %v635_v59 = vld [vmem:[#allocation2 + $0x8] sm:$0xf]  ;;  %v648_v0 = vmul.f32 %v646_v61, %v1299_v50  ;;  %v449_v2 = vmul.f32 %v1299_v50, %v447_v60  ;;  %v499_v16 = vmul.f32 %v1299_v50, %v497_v10 }
 0x11c   : > { %425 = vrot.lane.b32.xlu0 %v420_v49, %s1126_s13  ;;  %v530_v52 = vpop.permute.xlu1 %529  ;;  %v649_v63 = vmul.f32 %v646_v61, %v635_v59  ;;  %v486_v9 = vld [vmem:[#allocation2 + $0x8] sm:$0xf]  ;;  %v469_v11 = vmul.f32 %v463_v62, %v450_v1  ;;  %v568_v28 = vmul.f32 %v566_v18, %v1299_v50  ;;  %v569_v29 = vmul.f32 %v566_v18, %v526_v55 }
 0x11d   : > { %v537_v53 = vrot.slane %v530_v52, %v1284_v26  ;;  %423 = vrot.lane.b32.xlu1 %v419_v51, %s1126_s13  ;;  %v468_v12 = vmul.f32 %v465_v6, %v449_v2  ;;  %v500_v17 = vmul.f32 %v497_v10, %v486_v9  ;;  %v595_v25 = vld [vmem:[#allocation2 + $0x8] sm:$0xf]  ;;  %v608_v34 = vmul.f32 %v606_v27, %v1299_v50  ;;  %s299_s13 = scalar_lea.vmem [#allocation3], %s968_s10 }
 0x11e   : > { %v609_v33 = vmul.f32 %v606_v27, %v595_v25  ;;  %v1135_v47 = vmov 3  }
 0x11f   : > { %v539_v56 = vmul.f32 %v537_v53, %v1299_v50  ;;  %v540_v57 = vmul.f32 %v537_v53, %v526_v55  ;;  %v617_v39 = vmul.f32 %v614_v35, %v608_v34 }
 0x120   : > { %v502_v58 = vpop.permute.xlu1 %501  ;;  %v618_v38 = vmul.f32 %v612_v23, %v609_v33 }
 0x121   : > { %545 = vrot.lane.b32.xlu0 %v540_v57, %s1127_s17  ;;  %543 = vrot.lane.b32.xlu1 %v539_v56, %s1127_s17  ;;  %v503_v4 = vrot.slane %v502_v58, 4  ;;  %s988_s17 = sshll.u32 %s1203_s9, 7 }
 0x123   : > { %v505_v13 = vsel %vm504_vm7, %v503_v4, %v502_v58  ;;  %v509_v22 = vmul.f32 %v503_v4, %v500_v17  ;;  %v387_v58 = vrot.slane %v380_v48, %v1284_v26  ;;  %v714_v48 = vsub.s32 4, %v1233_v3 }
 0x124   : > { %v571_v5 = vpop.permute.xlu1 %570  ;;  %v508_v21 = vmul.f32 %v505_v13, %v499_v16 }
 0x125   : > { %654 = vrot.lane.b32.xlu0 %v649_v63, %s1128_s18  ;;  %652 = vrot.lane.b32.xlu1 %v648_v0, %s1128_s18  ;;  %v572_v14 = vrot.slane %v571_v5, 4 }
 0x127   : > { %v574_v24 = vsel %vm573_vm8, %v572_v14, %v571_v5  ;;  %v578_v32 = vmul.f32 %v572_v14, %v569_v29 }
 0x128   : > { %v668_v15 = vpop.permute.xlu1 %667  ;;  %v577_v31 = vmul.f32 %v574_v24, %v568_v28 }
 0x129   : > { %474 = vrot.lane.b32.xlu0 %v469_v11, %s1129_s19  ;;  %472 = vrot.lane.b32.xlu1 %v468_v12, %s1129_s19  ;;  %v675_v37 = vrot.slane %v668_v15, %v1284_v26 }
 0x12b   : > { %v677_v41 = vmul.f32 %v675_v37, %v1299_v50  ;;  %v678_v42 = vmul.f32 %v675_v37, %v635_v59  ;;  %v389_v59 = vmul.f32 %v1299_v50, %v387_v58 }
 0x12c   : > { %v680_v30 = vpop.permute.xlu1 %679 }
 0x12d   : > { %514 = vrot.lane.b32.xlu0 %v509_v22, %s1130_s20  ;;  %512 = vrot.lane.b32.xlu1 %v508_v21, %s1130_s20  ;;  %v681_v36 = vrot.slane %v680_v30, 4  ;;  %v401_v2 = vmul.f32 %v1272_v20, %v389_v59  ;;  %v788_v59 = vsub.s32 3, %v1233_v3  ;;  %s849_s20 = scalar_lea.hbm %s1393_s6, %s988_s17 }
 0x12f   : > { %v683_v40 = vsel %vm682_vm10, %v681_v36, %v680_v30  ;;  %v687_v44 = vmul.f32 %v681_v36, %v678_v42 }
 0x130   : > { %v686_v43 = vmul.f32 %v683_v40, %v677_v41 }
 0x131   : > { %583 = vrot.lane.b32.xlu0 %v578_v32, %s1131_s21  ;;  %581 = vrot.lane.b32.xlu1 %v577_v31, %s1131_s21  ;;  %s851_s21 = sshll.u32 %s299_s13, 4  ;;  %s852_s21 = int_to_ptr.vmem [resolvable:$true] %s851_s21 }
 0x132   : > { %p1061_p0 = scmp.lt.s32.totalorder %s852_s21, %s1059_s25 }
 0x135   : > { %623 = vrot.lane.b32.xlu0 %v618_v38, %s1132_s22  ;;  %621 = vrot.lane.b32.xlu1 %v617_v39, %s1132_s22  ;;  %s829_s22 = scalar_lea.sflag [#allocation4], %s297_s26 }
 0x139   : > { %692 = vrot.lane.b32.xlu0 %v687_v44, %s1133_s23  ;;  %690 = vrot.lane.b32.xlu1 %v686_v43, %s1133_s23  ;;  %s1054_s23 = scalar_lea.vmem %s852_s21, 128 }
 0x13a   : > { %p1055_p11 = scmp.ne.s32.totalorder %s852_s21, %s1054_s23  ;;  %p1062_p1 = scmp.lt.s32.totalorder %s1060_s0, %s1054_s23 }
 0x13c   : > { %p1056_p12 = pnand %p1055_p11, %p1220_p5  ;;  %p1063_p2 = por %p1062_p1, %p1061_p0 }
 0x13d   : > { %731 = vperm.xlu0 %1050, %v701_v45   ;;  %704 = vperm.xlu1 %1049, %v701_v45  }
 0x13e   : > { %p1057_p13 = pneg %p1056_p12 }
 0x140   : > { %p1064_p3 = pnand %p1063_p2, %p1057_p13 }
 0x141   : > { %1051 = vset.pattern.permute.xlu1 %v1134_v46  ;;  %1053 = vset.pattern.permute.xlu0 %v1135_v47 }
 0x142   : > { %757 = vperm.xlu1 %1051, %v701_v45  }
 0x146   : > { %1052 = vset.pattern.permute.xlu1 %v1135_v47  ;;  %v740_v47 = vsub.s32 5, %v1233_v3 }
 0x147   : > { %783 = vperm.xlu1 %1052, %v701_v45  }
 0x18e   : > { %v426_v49 = vpop.permute.xlu0 %425 }
 0x18f   : > { %v424_v51 = vpop.permute.xlu1 %423  ;;  %v428_v54 = vrot.slane %v426_v49, 4  ;;  %v762_v49 = vsub.s32 2, %v1233_v3 }
 0x190   : > { %v427_v55 = vrot.slane %v424_v51, 4 }
 0x192   : > { %v430_v60 = vsel %vm429_vm11, %v427_v55, %v428_v54 }
 0x193   : > { %v546_v52 = vpop.permute.xlu0 %545  ;;  %v544_v53 = vpop.permute.xlu1 %543  ;;  %v432_v1 = vsel %vm431_vm12, %v424_v51, %v430_v60  ;;  %v766_v51 = vsub.s32 6, %v1233_v3  ;;  %v792_v60 = vsub.s32 7, %v1233_v3 }
 0x194   : > { %v548_v4 = vrot.slane %v546_v52, 4  ;;  %v547_v5 = vrot.slane %v544_v53, 4  ;;  %v434_v11 = vadd.f32 %v432_v1, %v401_v2 }
 0x196   : > { %v549_v13 = vsel %vm429_vm11, %v547_v5, %v548_v4 }
 0x197   : > { %v655_v56 = vpop.permute.xlu0 %654  ;;  %v653_v57 = vpop.permute.xlu1 %652  ;;  %v551_v22 = vsel %vm550_vm15, %v544_v53, %v549_v13 }
 0x198   : > { %v657_v25 = vrot.slane %v655_v56, 4  ;;  %v656_v27 = vrot.slane %v653_v57, 4 }
 0x19a   : > { %v658_v35 = vsel %vm429_vm11, %v656_v27, %v657_v25 }
 0x19b   : > { %v475_v61 = vpop.permute.xlu0 %474  ;;  %v473_v62 = vpop.permute.xlu1 %472  ;;  %v660_v42 = vsel %vm659_vm2, %v653_v57, %v658_v35 }
 0x19c   : > { %v477_v63 = vrot.slane %v475_v61, 4  ;;  %v476_v0 = vrot.slane %v473_v62, 4 }
 0x19e   : > { %v478_v6 = vsel %vm429_vm11, %v476_v0, %v477_v63 }
 0x19f   : > { %v480_v9 = vsel %vm479_vm13, %v473_v62, %v478_v6  ;;  %v515_v10 = vpop.permute.xlu0 %514  ;;  %v513_v26 = vpop.permute.xlu1 %512 }
 0x1a0   : > { %v517_v50 = vrot.slane %v515_v10, 4  ;;  %v516_v12 = vrot.slane %v513_v26, 4  ;;  %v482_v14 = vadd.f32 %v480_v9, %v434_v11 }
 0x1a2   : > { %v518_v15 = vsel %vm429_vm11, %v516_v12, %v517_v50 }
 0x1a3   : > { %v520_v16 = vsel %vm519_vm14, %v513_v26, %v518_v15  ;;  %v584_v17 = vpop.permute.xlu0 %583  ;;  %v582_v20 = vpop.permute.xlu1 %581 }
 0x1a4   : > { %v522_v18 = vadd.f32 %v520_v16, %v482_v14  ;;  %v586_v19 = vrot.slane %v584_v17, 4  ;;  %v585_v21 = vrot.slane %v582_v20, 4 }
 0x1a6   : > { %v553_v23 = vadd.f32 %v551_v22, %v522_v18  ;;  %v587_v24 = vsel %vm429_vm11, %v585_v21, %v586_v19 }
 0x1a7   : > { %v589_v28 = vsel %vm588_vm0, %v582_v20, %v587_v24  ;;  %v624_v29 = vpop.permute.xlu0 %623  ;;  %v622_v30 = vpop.permute.xlu1 %621 }
 0x1a8   : > { %v626_v31 = vrot.slane %v624_v29, 4  ;;  %v625_v32 = vrot.slane %v622_v30, 4  ;;  %v591_v33 = vadd.f32 %v589_v28, %v553_v23 }
 0x1aa   : > { %v627_v34 = vsel %vm429_vm11, %v625_v32, %v626_v31 }
 0x1ab   : > { %v629_v36 = vsel %vm628_vm1, %v622_v30, %v627_v34  ;;  %v693_v37 = vpop.permute.xlu0 %692  ;;  %v691_v38 = vpop.permute.xlu1 %690 }
 0x1ac   : > { %v631_v39 = vadd.f32 %v629_v36, %v591_v33  ;;  %v695_v40 = vrot.slane %v693_v37, 4  ;;  %v694_v41 = vrot.slane %v691_v38, 4 }
 0x1ae   : > { %v696_v43 = vsel %vm429_vm11, %v694_v41, %v695_v40  ;;  %v662_v44 = vadd.f32 %v660_v42, %v631_v39 }
 0x1af   : > { %v698_v45 = vsel %vm697_vm3, %v691_v38, %v696_v43 }
 0x1b0   : > { %v700_v46 = vadd.f32 %v698_v45, %v662_v44 }
 0x1b2   : > { %v737_v52 = vrot.slane %v700_v46, %v1248_v8  ;;  %v741_v53 = vrot.slane %v700_v46, %v740_v47  ;;  %v711_v54 = vrot.slane %v700_v46, %v1245_v7  ;;  %v715_v55 = vrot.slane %v700_v46, %v714_v48 }
 0x1b3   : > { %v763_v57 = vrot.slane %v700_v46, %v762_v49  ;;  %v767_v58 = vrot.slane %v700_v46, %v766_v51  ;;  %v789_v5 = vrot.slane %v700_v46, %v788_v59  ;;  %v793_v6 = vrot.slane %v700_v46, %v792_v60 }
 0x1b4   : > { %v747_v62 = vrot.slane %v737_v52, %v1248_v8  ;;  %v751_v63 = vrot.slane %v741_v53, %v1248_v8  ;;  %v721_v0 = vrot.slane %v711_v54, %v1245_v7  ;;  %v725_v1 = vrot.slane %v715_v55, %v1245_v7 }
 0x1b5   : > { %v773_v2 = vrot.slane %v763_v57, %v762_v49  ;;  %v777_v4 = vrot.slane %v767_v58, %v762_v49  ;;  %v799_v15 = vrot.slane %v789_v5, %v788_v59  ;;  %v803_v8 = vrot.slane %v793_v6, %v788_v59 }
 0x1b8   : > { %v705_v56 = vpop.permute.xlu1 %704  ;;  %v732_v61 = vpop.permute.xlu0 %731 }
 0x1b9   : > { %v752_v9 = vmul.f32 %v747_v62, %v732_v61  ;;  %v753_v10 = vmul.f32 %v751_v63, %v732_v61  ;;  %v726_v26 = vmul.f32 %v721_v0, %v705_v56  ;;  %v727_v11 = vmul.f32 %v725_v1, %v705_v56 }
 0x1bb   : > { %v754_v13 = vadd.f32 %v752_v9, %v726_v26  ;;  %v755_v14 = vadd.f32 %v753_v10, %v727_v11 }
 0x1bd   : > { %v758_v50 = vpop.permute.xlu1 %757 }
 0x1be   : > { %v778_v3 = vmul.f32 %v773_v2, %v758_v50  ;;  %v779_v12 = vmul.f32 %v777_v4, %v758_v50 }
 0x1c0   : > { %v780_v17 = vadd.f32 %v778_v3, %v754_v13  ;;  %v781_v7 = vadd.f32 %v779_v12, %v755_v14 }
 0x1c2   : > { %v784_v16 = vpop.permute.xlu1 %783 }
 0x1c3   : > { %v804_v20 = vmul.f32 %v799_v15, %v784_v16  ;;  %v805_v18 = vmul.f32 %v803_v8, %v784_v16 }
 0x1c5   : > { %v806_v19 = vadd.f32 %v804_v20, %v780_v17  ;;  %v807_v21 = vadd.f32 %v805_v18, %v781_v7 }
 0x1c7   : > { %v813_v22 = vsel %vm429_vm11, %v806_v19, 0.0  ;;  %v814_v23 = vsel %vm429_vm11, %v807_v21, 0.0  ;;  %v820_v24 = vmul.f32 %v806_v19, %v806_v19  ;;  %v821_v25 = vmul.f32 %v807_v21, %v807_v21 }
 0x1c8   : > { %v815_v27 = vadd.f32 %v814_v23, %v813_v22  ;;  %v810_v28 = vcombine.low %v806_v19, %v807_v21 }
 0x1c9   : > { %v822_v29 = vsel %vm429_vm11, %v820_v24, 0.0  ;;  %v823_v30 = vsel %vm429_vm11, %v821_v25, 0.0 }
 0x1ca   : > { %816 = vadd.xlane.f32.xlu0 %v815_v27  ;;  %v824_v31 = vadd.f32 %v823_v30, %v822_v29  ;;  %812 = vst [vmem:[%s299_s13] sm:$0xff] %v810_v28 }
 0x1cc   : > { %825 = vadd.xlane.f32.xlu1 %v824_v31 }
 0x1cd   : > { %1067 = shalt.err (!%p1064_p3)
}
 0x1ce   : > { %s1068_s9 = scalar_lea.hbm %s849_s20, 128  ;;  %s1072_s13 = scalar_lea.hbm %s1393_s6, 256 }
 0x1cf   : > { %p1069_p4 = scmp.ne.s32.totalorder %s849_s20, %s1068_s9  ;;  %p1073_p9 = scmp.lt.s32.totalorder %s849_s20, %s1393_s6 }
 0x1d0   : > { %p1074_p10 = scmp.lt.s32.totalorder %s1072_s13, %s1068_s9 }
 0x1d1   : > { %p1070_p7 = pnand %p1069_p4, %p1220_p5 }
 0x1d2   : > { %p1075_p11 = por %p1074_p10, %p1073_p9 }
 0x1d3   : > { %p1071_p8 = pneg %p1070_p7 }
 0x1d5   : > { %p1076_p12 = pnand %p1075_p11, %p1071_p8 }
 0x1d7   : > { %1079 = shalt.err (!%p1076_p12)
}
 0x1d8   : > { %989 = dma.vmem_to_hbm [thread:$0]  (%p1220_p5), %s852_s21, 128, %s849_s20, %s829_s22   ;;  %vm818_vm4 = vcmask 3072  }
 0x1d9   : > { %s971_s0 = sshll.u32 %s1280_s12, 2 }
 0x1da   : > { %s320_s24 = scalar_lea.vmem %s1394_s7, %s971_s0  ;;  %s324_s10 = scalar_lea.vmem %s1395_s8, %s971_s0 }
 0x253   : > { %v817_v32 = vpop.xlane.xlu0 %816 }
 0x254   : > { %819 = vst.msk [vmem:[%s320_s24] sm:$0xf] %vm818_vm4, %v817_v32 }
 0x255   : > { %v826_v33 = vpop.xlane.xlu1 %825 }
 0x256   : > { %827 = vst.msk [vmem:[%s324_s10] sm:$0xf] %vm818_vm4, %v826_v33 }
 0x257 PF: > { %p995_p13 = scmp.ge.s32.totalorder %s1114_s30, 2  ;;  %s869_s15 = sand.u32 1, %s1102_s27  }
 0x258   : > { %s870_s12 = scalar_lea.sflag [#allocation4], %s869_s15 }
 0x259   : > { %p992_p5 = pnand %p995_p13, %p1224_p6 }
 0x25b   : > { %p993_p0 = pneg %p992_p5 }
 0x25d   : > { %1097 = dma.done.wait (%p993_p0), %s870_s12, 128  }
 0x25e   : > { %1099 = vsyncadd (%p993_p0), %s870_s12, 4294967168  ;;  %p19_p1 = scmp.ge.s32.totalorder %s1207_s11, 4   ;;  %s1400_s27 = smov %s1106_s28 }
 0x25f   : > { %s1401_s28 = smov %s1110_s29  ;;  %s1402_s29 = smov %s1218_s14 }
 0x260   : > { %s1403_s30 = smov %s1207_s11  ;;  %21 = sbr.rel (!%p19_p1) target bundleno = 5 (0x5), region = 112 }
 0x265   :  { %889 = vsyncpa [#allocation4], 1 }
 0x266   :  { %891 = vsyncpa [#allocation4 + $0x1], 1 }

</bundles_post_ra>
